<compile_context>
chip_gen: v7x
topology: tpu7x:2x2x1
jax: 0.10.0
libtpu: 0.0.40
codegen_flags: <defaults>
</compile_context>

<pallas_src>
import jax
import jax.numpy as jnp
from jax.experimental import pallas as pl
from jax.experimental.pallas import tpu as pltpu

LANES = 1024                  # lane-dense slab width (multiple of 128)
TARGET_BLOCK_BYTES = 8 << 20  # ~8 MiB per grid step


def _round_up(a, b):
    return (a + b - 1) // b * b


def _alrelu_kernel(slope_ref, x_ref, o_ref):
    # slope_ref: SMEM f32[1] (learnable negative slope)
    # x_ref/o_ref: VMEM (row_tile, LANES) in the input's native dtype
    x = x_ref[...]
    s = slope_ref[0]
    xf = x.astype(jnp.float32)                       # in-register; free for f32
    o_ref[...] = jnp.where(xf >= 0, xf, xf * s).astype(o_ref.dtype)


def _adaptive_leaky_relu_impl(x, negative_slope):
    orig_shape = x.shape
    total = x.size
    dtype = x.dtype
    itemsize = jnp.dtype(dtype).itemsize
    # Sublane multiple for packed dtypes: 8 (32-bit), 16 (16-bit), 32 (8-bit).
    sub = max(8, 32 // max(1, itemsize))

    flat = x.reshape(-1)                             # contiguous reshape: free
    rows = pl.cdiv(total, LANES)
    pad = rows * LANES - total
    if pad:
        # Only the last partial 1024-lane slab is padded (0 bytes for demo shape).
        flat = jnp.pad(flat, (0, pad))
    x2 = flat.reshape(rows, LANES)

    # Tile selection: fat (~8 MiB) blocks, but keep >=4 grid steps for
    # medium/large tensors (v7x megacore + pipelining).  Tiny tensors use a
    # single full-extent block (exempt from the (8,128) divisibility rule).
    target_rows = max(sub, (TARGET_BLOCK_BYTES // (LANES * itemsize)) // sub * sub)
    if rows <= 2 * sub:
        row_tile = rows
    else:
        row_tile = min(target_rows, max(sub, _round_up(pl.cdiv(rows, 4), sub)))
    grid = pl.cdiv(rows, row_tile)

    block_bytes = row_tile * LANES * itemsize
    # Double-buffered in + out = 4 * block_bytes, plus headroom; cap at 48 MiB
    # so it also fits v7x's 64 MiB physical VMEM.
    vmem_limit = int(min(48 << 20, max(16 << 20, 4 * block_bytes + (4 << 20))))

    slope = jnp.asarray(negative_slope, jnp.float32).reshape(1)

    out2 = pl.pallas_call(
        _alrelu_kernel,
        out_shape=jax.ShapeDtypeStruct((rows, LANES), dtype),
        grid_spec=pltpu.PrefetchScalarGridSpec(
            num_scalar_prefetch=0,
            grid=(grid,),
            in_specs=[
                pl.BlockSpec(memory_space=pltpu.MemorySpace.SMEM),      # slope
                pl.BlockSpec((row_tile, LANES), lambda i: (i, 0)),      # x slab
            ],
            out_specs=pl.BlockSpec((row_tile, LANES), lambda i: (i, 0)),
        ),
        compiler_params=pltpu.CompilerParams(
            dimension_semantics=("parallel",),
            vmem_limit_bytes=vmem_limit),
    )(slope, x2)

    if pad:
        return out2.reshape(-1)[:total].reshape(orig_shape)
    return out2.reshape(orig_shape)


@jax.custom_vjp
def adaptive_leaky_relu(x, negative_slope):
    """y = leaky_relu(x, negative_slope), negative_slope is a learnable scalar."""
    return _adaptive_leaky_relu_impl(x, negative_slope)


def _alrelu_vjp_fwd(x, negative_slope):
    return _adaptive_leaky_relu_impl(x, negative_slope), (x, negative_slope)


def _alrelu_vjp_bwd(res, g):
    x, s = res
    neg = x < 0
    dx = jnp.where(neg, g * jnp.asarray(s, g.dtype), g)
    ds = jnp.sum(jnp.where(neg, g.astype(jnp.float32) * x.astype(jnp.float32), 0.0))
    ds = ds.astype(jnp.result_type(s))
    return dx, ds


adaptive_leaky_relu.defvjp(_alrelu_vjp_fwd, _alrelu_vjp_bwd)


def _reference(x, negative_slope):
    # Pure-JAX reference of F.leaky_relu(x, negative_slope).
    return jnp.where(x >= 0, x, x * negative_slope)


if __name__ == "__main__":
    key = jax.random.PRNGKey(0)
    (kx,) = jax.random.split(key, 1)

    N, C, H, W = 2, 4, 16, 16
    x = jax.random.normal(kx, (N, C, H, W), dtype=jnp.float32)
    negative_slope = jnp.float32(0.01)   # initial value of the learnable param

    out = jax.block_until_ready(adaptive_leaky_relu(x, negative_slope))
    ref = jax.block_until_ready(_reference(x, negative_slope))

    assert out.shape == x.shape
    assert out.dtype == x.dtype
    assert jnp.allclose(out, ref, atol=1e-6, rtol=1e-6), (
        f"max abs diff {jnp.max(jnp.abs(out - ref))}")

    # Gradient check for the learnable slope / input (custom VJP).
    gx, gs = jax.grad(lambda a, s: adaptive_leaky_relu(a, s).sum(),
                      argnums=(0, 1))(x, negative_slope)
    gx_ref = jnp.where(x >= 0, 1.0, negative_slope)
    gs_ref = jnp.sum(jnp.where(x < 0, x, 0.0))
    gx, gs = jax.block_until_ready((gx, gs))
    assert jnp.allclose(gx, gx_ref, atol=1e-6, rtol=1e-6)
    assert jnp.allclose(gs, gs_ref, atol=1e-4, rtol=1e-4)

    print("KERNEL_OK")
</pallas_src>

<mosaic_0001>
module attributes {stable_mosaic.version = 11 : i64} {
  func.func @_alrelu_kernel(%arg0: i32, %arg1: memref<1xf32, #tpu.memory_space<smem>>, %arg2: memref<2x1024xf32, #tpu.memory_space<vmem>>, %arg3: memref<2x1024xf32, #tpu.memory_space<vmem>>) attributes {dimension_semantics = [#tpu.dimension_semantics<parallel>], iteration_bounds = array<i64: 1>, scalar_prefetch = 0 : i64, scratch_operands = 0 : i64, tpu.core_type = #tpu.core_type<tc>, window_params = [{transform_indices = @transform_0, window_bounds = array<i64: 1>}, {transform_indices = @transform_1, window_bounds = array<i64: 2, 1024>}, {transform_indices = @transform_2, window_bounds = array<i64: 2, 1024>}]} {
    %c0 = arith.constant 0 : index
    %c0_0 = arith.constant 0 : index
    %0 = vector.load %arg2[%c0, %c0_0] : memref<2x1024xf32, #tpu.memory_space<vmem>>, vector<2x1024xf32>
    %c0_1 = arith.constant 0 : index
    %1 = memref.load %arg1[%c0_1] : memref<1xf32, #tpu.memory_space<smem>>
    %cst = arith.constant 0.000000e+00 : f32
    %2 = vector.broadcast %cst : f32 to vector<2x1024xf32>
    %3 = arith.cmpf oge, %0, %2 : vector<2x1024xf32>
    %4 = vector.broadcast %1 : f32 to vector<2x1024xf32>
    %5 = arith.mulf %0, %4 : vector<2x1024xf32>
    %6 = arith.select %3, %0, %5 : vector<2x1024xi1>, vector<2x1024xf32>
    %c0_2 = arith.constant 0 : index
    %c0_3 = arith.constant 0 : index
    %7 = vector.load %arg3[%c0_2, %c0_3] : memref<2x1024xf32, #tpu.memory_space<vmem>>, vector<2x1024xf32>
    tpu.vector_store %arg3[%c0_2, %c0_3], %6 {strides = array<i32>} : memref<2x1024xf32, #tpu.memory_space<vmem>>, vector<2x1024xf32>,
    return
  }
  func.func @transform_0(%arg0: i32) -> i32 {
    %c0_i32 = arith.constant 0 : i32
    %c0_i32_0 = arith.constant 0 : i32
    return %c0_i32 : i32
  }
  func.func @transform_1(%arg0: i32) -> (i32, i32) {
    %c0_i32 = arith.constant 0 : i32
    %c0_i32_0 = arith.constant 0 : i32
    return %arg0, %c0_i32 : i32, i32
  }
  func.func @transform_2(%arg0: i32) -> (i32, i32) {
    %c0_i32 = arith.constant 0 : i32
    %c0_i32_0 = arith.constant 0 : i32
    return %arg0, %c0_i32 : i32, i32
  }
}

</mosaic_0001>

<bundles_post_ra>
// kernel: tpu_custom_call.1
= control target key start
LH: loop header
LB: loop body
LE: loop exit
PB: predicated region body
PF: predicated region fallthrough
CT: control target
= control target key end

     0   :  { %8 = vsyncpa [#allocation4], 0  ;;  %s146_s0 = inlined_call_operand.<no memory space> [shape: f32[1], index: 0, kind: input, shape index: {}]   ;;  %s147_s1 = inlined_call_operand.hbm [shape: f32[2,1024], index: 1, kind: input, shape index: {}]   ;;  %s148_s2 = inlined_call_operand.hbm [shape: f32[2,1024], index: 2, kind: output, shape index: {}]  }
   0x1   :  { %9 = vsyncpa [#allocation5], 0  ;;  %s102_s9 = smov [#allocation3]   ;;  %s54_s13 = scalar_lea.hbm %s147_s1, 256 }
   0x2   :  { %s18_s10 = sshll.u32 %s102_s9, 4  ;;  %p55_p0 = scmp.ne.s32.totalorder %s147_s1, %s54_s13  ;;  %s19_s10 = int_to_ptr.vmem [resolvable:$true] %s18_s10 }
   0x3   :  { %p58_p1 = scmp.lt.u32.totalorder %s54_s13, %s147_s1 }
   0x5   :  { %p60_p2 = pnand %p58_p1, %p55_p0 }
   0x7   :  { %63 = shalt.err (!%p60_p2)
}
   0x8   :  { %s64_s18 = scalar_lea.vmem %s19_s10, 256  ;;  %p69_p4 = scmp.lt.s32.totalorder %s19_s10, %s19_s10 }
   0x9   :  { %p65_p3 = scmp.ne.s32.totalorder %s19_s10, %s64_s18  ;;  %p70_p5 = scmp.lt.s32.totalorder %s64_s18, %s64_s18 }
   0xb   :  { %p71_p6 = por %p70_p5, %p69_p4 }
   0xd   :  { %p72_p7 = pnand %p71_p6, %p65_p3 }
   0xf   :  { %75 = shalt.err (!%p72_p7)
}
  0x10   :  { %21 = dma.hbm_to_vmem [thread:$0]  %s147_s1, 256, %s19_s10, [#allocation4]  }
  0x11   :  { %98 = dma.done.wait [#allocation4], 256  }
  0x12   :  { %99 = vsyncadd [#allocation4], 4294967040  ;;  %v30_v0 = vstv %s146_s0  ;;  %s103_s23 = smov [#allocation6]   ;;  %v25_v1 = vld [vmem:[#allocation3] sm:$0xff]  ;;  %v26_v2 = vld [vmem:[#allocation3 + $0x8] sm:$0xff] }
  0x13   :  { %s43_s24 = sshll.u32 %s103_s23, 4  ;;  %vm28_vm0 = vcmp.ge.f32.partialorder %v25_v1, 0.0  ;;  %v31_v3 = vmul.f32 %v30_v0, %v25_v1  ;;  %vm29_vm1 = vcmp.ge.f32.partialorder %v26_v2, 0.0  ;;  %v32_v4 = vmul.f32 %v30_v0, %v26_v2  ;;  %s44_s24 = int_to_ptr.vmem [resolvable:$true] %s43_s24 }
  0x14   :  { %s76_s1 = scalar_lea.vmem %s44_s24, 256  ;;  %p81_p9 = scmp.lt.s32.totalorder %s44_s24, %s44_s24 }
  0x15   :  { %v33_v5 = vsel %vm28_vm0, %v25_v1, %v31_v3  ;;  %v34_v6 = vsel %vm29_vm1, %v26_v2, %v32_v4  ;;  %p77_p8 = scmp.ne.s32.totalorder %s44_s24, %s76_s1  ;;  %p82_p10 = scmp.lt.s32.totalorder %s76_s1, %s76_s1 }
  0x16   :  { %35 = vst [vmem:[#allocation6] sm:$0xff] %v33_v5  ;;  %36 = vst [vmem:[#allocation6 + $0x8] sm:$0xff] %v34_v6 }
  0x17   :  { %p83_p11 = por %p82_p10, %p81_p9 }
  0x19   :  { %p84_p12 = pnand %p83_p11, %p77_p8 }
  0x1b   :  { %87 = shalt.err (!%p84_p12)
}
  0x1c   :  { %s88_s26 = scalar_lea.hbm %s148_s2, 256 }
  0x1d   :  { %p89_p13 = scmp.ne.s32.totalorder %s148_s2, %s88_s26  ;;  %p92_p0 = scmp.lt.u32.totalorder %s88_s26, %s148_s2 }
  0x1f   :  { %p94_p1 = pnand %p92_p0, %p89_p13 }
  0x21   :  { %97 = shalt.err (!%p94_p1)
}
  0x22   :  { %46 = dma.vmem_to_hbm [thread:$0]  %s44_s24, 256, %s148_s2, [#allocation5]  }
  0x23   :  { %100 = dma.done.wait [#allocation5], 256  }
  0x24   :  { %101 = vsyncadd [#allocation5], 4294967040 }
  0x25   :  { %50 = vsyncpa [#allocation4], 1 }
  0x26   :  { %51 = vsyncpa [#allocation5], 1 }

</bundles_post_ra>
